<compile_context>
chip_gen: v5e
topology: v5e:2x2
jax: 0.10.0
libtpu: 0.0.40
codegen_flags: <defaults>
</compile_context>

<pallas_src>
import jax
import jax.numpy as jnp
from jax.experimental import pallas as pl
from jax.experimental.pallas import tpu as pltpu


# ----------------------------- config (synthetic) -----------------------------
VOCAB_DIM = 16
EMBEDDING_DIM = 32
MLP_CONFIG = (64, 32)          # hidden dims of self.MLP (Linear+ReLU each)
BBOX_DIM = 4                   # source/target bbox each have 4 features -> "+ 8"
BATCH = 8

_LANES = 128
_TILE_B_MAX = 4096             # max batch rows per grid step (VMEM is a non-issue)
_MIN_SPLIT = 1024              # force >=2 grid steps once B >= 2*_MIN_SPLIT (v7x)


def _round_up(x, m):
    return (x + m - 1) // m * m


def _cdiv(a, b):
    return (a + b - 1) // b


# ------------------------------- parameter init -------------------------------
def init_params(key):
    """Deterministic parameter init (PyTorch Linear shapes: W [out,in], b [out])."""
    ks = jax.random.split(key, 16)

    def linear(k, in_dim, out_dim):
        kw, kb = jax.random.split(k)
        bound = 1.0 / jnp.sqrt(float(in_dim))
        w = jax.random.uniform(kw, (out_dim, in_dim), jnp.float32, -bound, bound)
        b = jax.random.uniform(kb, (out_dim,), jnp.float32, -bound, bound)
        return w, b

    params = {"class_mlp": linear(ks[0], VOCAB_DIM, EMBEDDING_DIM)}
    mlp = []
    prev = EMBEDDING_DIM * 2 + 2 * BBOX_DIM   # EMBEDDING_DIM * 2 + 8
    for i, dim in enumerate(MLP_CONFIG):
        mlp.append(linear(ks[1 + i], prev, dim))
        prev = dim
    params["mlp"] = mlp
    params["head"] = linear(ks[10], MLP_CONFIG[-1], 1)
    return params


# --------------------------- one-time weight packing ---------------------------
def pack_params(params, mxu_dtype=jnp.bfloat16):
    """Fold class_mlp into the first MLP layer and pack every weight into one
    lane-aligned slab (mxu_dtype); biases go into a small separate f32 slab.

    NOTE: the fold is valid only because class_mlp is a plain Linear (no
    activation / norm / dropout).  If the model changes, re-derive the fold.

    Returns (w_slab, b_slab, layout, mxu_dtype); layout is static:
      (first_blocks, rest_blocks)
        first_blocks: 4x (row_offset, in_dim)      for [sb, tb, sc, tc]
        rest_blocks:  per-layer (row_offset, relu) -- each a [128, 128] tile
    """
    f32 = jnp.float32
    E, BB = EMBEDDING_DIM, BBOX_DIM

    w_cls, b_cls = params["class_mlp"]          # [E, V], [E]
    w1, b1 = params["mlp"][0]                   # [D1, 2E+2BB], [D1]
    D1 = w1.shape[0]
    assert D1 <= _LANES, "first hidden dim must fit in 128 lanes"
    w1_t = w1.T.astype(f32)                     # [2E+2BB, D1]
    # original combined layout: [src_bbox(BB), src_emb(E), tgt_bbox(BB), tgt_emb(E)]
    w1_sb = w1_t[0:BB]                          # [BB, D1]
    w1_se = w1_t[BB:BB + E]                     # [E,  D1]
    w1_tb = w1_t[BB + E:2 * BB + E]             # [BB, D1]
    w1_te = w1_t[2 * BB + E:]                   # [E,  D1]
    wc_t = w_cls.T.astype(f32)                  # [V, E]

    w_sc = wc_t @ w1_se                         # [V, D1]  (class_mlp folded)
    w_tc = wc_t @ w1_te                         # [V, D1]
    b_fused = b1.astype(f32) + b_cls @ w1_se + b_cls @ w1_te      # [D1]

    chunks, row = [], 0
    first_blocks = []
    for wblk in (w1_sb, w1_tb, w_sc, w_tc):     # order must match kernel inputs
        in_dim = wblk.shape[0]
        rows8 = _round_up(in_dim, 8)
        pad = jnp.zeros((rows8, _LANES), f32).at[:in_dim, :D1].set(wblk)
        first_blocks.append((row, in_dim))
        chunks.append(pad)
        row += rows8

    biases = [b_fused]
    rest_blocks = []
    rest_layers = [(w.T.astype(f32), b.astype(f32), True)
                   for (w, b) in params["mlp"][1:]]
    w_h, b_h = params["head"]
    rest_layers.append((w_h.T.astype(f32), b_h.astype(f32), False))
    for (w, b, relu) in rest_layers:
        in_dim, out_dim = w.shape
        assert in_dim <= _LANES and out_dim <= _LANES, "dims must fit 128 lanes"
        # Full [128, 128] tile: zero rows/lanes are inert (h carried as 128 lanes).
        pad = jnp.zeros((_LANES, _LANES), f32).at[:in_dim, :out_dim].set(w)
        rest_blocks.append((row, relu))
        chunks.append(pad)
        biases.append(b)
        row += _LANES

    w_slab = jnp.concatenate(chunks, axis=0).astype(mxu_dtype)     # [304, 128]

    b_rows = _round_up(len(biases), 8)
    b_slab = jnp.zeros((b_rows, _LANES), f32)                      # biases stay f32
    for i, b in enumerate(biases):
        b_slab = b_slab.at[i, :b.shape[0]].set(b)

    layout = (tuple(first_blocks), tuple(rest_blocks))
    return w_slab, b_slab, layout, mxu_dtype


# ---------------------------------- kernel ------------------------------------
def make_kernel(layout, apply_sigmoid, mxu_dtype):
    """Kernel body: 4 accumulated input dots + chained 128x128 matmuls over one
    VMEM-resident weight slab; f32 accumulation + f32 biases throughout."""
    first_blocks, rest_blocks = layout

    def kernel(sb_ref, tb_ref, sc_ref, tc_ref, w_ref, b_ref, o_ref):
        f32 = jnp.float32
        in_refs = (sb_ref, tb_ref, sc_ref, tc_ref)

        # Fused layer 1: four accumulated MXU dots (class_mlp folded in).
        h = None
        for x_ref, (row, in_dim) in zip(in_refs, first_blocks):
            d = jnp.dot(x_ref[...], w_ref[row:row + in_dim, :],
                        preferred_element_type=f32)
            h = d if h is None else h + d
        h = jnp.maximum(h + b_ref[0:1, :], 0.0)          # [tile_b, 128], f32

        # Remaining layers: full 128x128 weight tiles, zero lanes are inert.
        for li, (row, relu) in enumerate(rest_blocks, start=1):
            h = jnp.dot(h.astype(mxu_dtype), w_ref[row:row + _LANES, :],
                        preferred_element_type=f32)
            h = h + b_ref[li:li + 1, :]
            if relu:
                h = jnp.maximum(h, 0.0)

        out = h[:, 0:1]                                  # head output lives in lane 0
        if apply_sigmoid:
            out = jax.nn.sigmoid(out)
        # [tile_b, 1] masked store: tiny, not on the critical path (per review).
        o_ref[...] = out.astype(o_ref.dtype)

    return kernel


# --------------------------------- wrapper ------------------------------------
def mlp_with_softclass_pallas(batch, packed, apply_sigmoid=False):
    w_slab, b_slab, layout, mxu_dtype = packed

    # Cast inputs to the MXU dtype in the wrapper (halves input HBM bytes for bf16).
    sb = batch["source_bbox"].astype(mxu_dtype)
    tb = batch["target_bbox"].astype(mxu_dtype)
    sc = batch["source_class"].astype(mxu_dtype)
    tc = batch["target_class"].astype(mxu_dtype)
    B = sb.shape[0]

    # Batch tiling: large sublane-aligned tiles (amortize ~0.35 us/grid-step),
    # minimal padding waste, and >=2 grid steps for big B so both v7x TCs work.
    n_steps = _cdiv(B, _TILE_B_MAX)
    if B >= 2 * _MIN_SPLIT:
        n_steps = max(n_steps, 2)
    tile_b = _round_up(_cdiv(B, n_steps), 8)
    b_pad = _round_up(B, tile_b)
    if b_pad != B:
        pad = ((0, b_pad - B), (0, 0))
        sb = jnp.pad(sb, pad)
        tb = jnp.pad(tb, pad)
        sc = jnp.pad(sc, pad)
        tc = jnp.pad(tc, pad)

    w_rows, lanes = w_slab.shape
    b_rows, _ = b_slab.shape
    out = pl.pallas_call(
        make_kernel(layout, apply_sigmoid, mxu_dtype),
        out_shape=jax.ShapeDtypeStruct((b_pad, 1), jnp.float32),
        grid=(b_pad // tile_b,),
        in_specs=[
            pl.BlockSpec((tile_b, sb.shape[1]), lambda i: (i, 0)),
            pl.BlockSpec((tile_b, tb.shape[1]), lambda i: (i, 0)),
            pl.BlockSpec((tile_b, sc.shape[1]), lambda i: (i, 0)),
            pl.BlockSpec((tile_b, tc.shape[1]), lambda i: (i, 0)),
            # Whole weight/bias slabs, same block every step -> VMEM-resident.
            pl.BlockSpec((w_rows, lanes), lambda i: (0, 0)),
            pl.BlockSpec((b_rows, lanes), lambda i: (0, 0)),
        ],
        out_specs=pl.BlockSpec((tile_b, 1), lambda i: (i, 0)),
        compiler_params=pltpu.CompilerParams(
            dimension_semantics=("parallel",)),          # shards steps on v7x's 2 TCs
    )(sb, tb, sc, tc, w_slab, b_slab)
    return out[:B] if b_pad != B else out


# ------------------------------ pure-JAX reference -----------------------------
def reference_forward(batch, params, apply_sigmoid=False):
    """Pure-JAX reference mirroring the PyTorch forward."""
    w_cls, b_cls = params["class_mlp"]
    se = batch["source_class"] @ w_cls.T + b_cls
    te = batch["target_class"] @ w_cls.T + b_cls
    src = jnp.concatenate([batch["source_bbox"], se], axis=-1)
    tgt = jnp.concatenate([batch["target_bbox"], te], axis=-1)
    h = jnp.concatenate([src, tgt], axis=-1)
    for (w, b) in params["mlp"]:
        h = jnp.maximum(h @ w.T + b, 0.0)
    w_h, b_h = params["head"]
    out = h @ w_h.T + b_h
    return jax.nn.sigmoid(out) if apply_sigmoid else out


if __name__ == "__main__":
    key = jax.random.PRNGKey(0)
    k_params, k_sc, k_tc, k_sb, k_tb = jax.random.split(key, 5)

    params = init_params(k_params)
    batch = {
        "source_class": jax.random.normal(k_sc, (BATCH, VOCAB_DIM), jnp.float32),
        "target_class": jax.random.normal(k_tc, (BATCH, VOCAB_DIM), jnp.float32),
        "source_bbox":  jax.random.uniform(k_sb, (BATCH, BBOX_DIM), jnp.float32),
        "target_bbox":  jax.random.uniform(k_tb, (BATCH, BBOX_DIM), jnp.float32),
    }

    ref = reference_forward(batch, params, apply_sigmoid=False)
    ref_sig = reference_forward(batch, params, apply_sigmoid=True)

    # f32 MXU path: should match the reference tightly despite the algebraic fold.
    packed_f32 = pack_params(params, mxu_dtype=jnp.float32)
    out = jax.block_until_ready(
        mlp_with_softclass_pallas(batch, packed_f32, apply_sigmoid=False))
    assert out.shape == (BATCH, 1)
    assert jnp.max(jnp.abs(out - ref)) < 1e-4, "f32 mismatch vs JAX reference"

    out_sig = jax.block_until_ready(
        mlp_with_softclass_pallas(batch, packed_f32, apply_sigmoid=True))
    assert jnp.max(jnp.abs(out_sig - ref_sig)) < 1e-4, "sigmoid mismatch"

    # bf16-MXU path (default perf variant): f32 accumulation + f32 biases,
    # looser tolerance (inputs and weights quantized to bf16).
    packed_bf16 = pack_params(params)                    # default bf16
    out_bf16 = jax.block_until_ready(
        mlp_with_softclass_pallas(batch, packed_bf16, apply_sigmoid=False))
    assert jnp.max(jnp.abs(out_bf16 - ref)) < 5e-2, "bf16 mismatch too large"

    # Exercise the non-multiple-of-8 / padded-batch path once (f32, tight tol).
    B2 = 20
    k2 = jax.random.split(key, 4)
    batch2 = {
        "source_class": jax.random.normal(k2[0], (B2, VOCAB_DIM), jnp.float32),
        "target_class": jax.random.normal(k2[1], (B2, VOCAB_DIM), jnp.float32),
        "source_bbox":  jax.random.uniform(k2[2], (B2, BBOX_DIM), jnp.float32),
        "target_bbox":  jax.random.uniform(k2[3], (B2, BBOX_DIM), jnp.float32),
    }
    ref2 = reference_forward(batch2, params, apply_sigmoid=False)
    out2 = jax.block_until_ready(
        mlp_with_softclass_pallas(batch2, packed_f32, apply_sigmoid=False))
    assert out2.shape == (B2, 1)
    assert jnp.max(jnp.abs(out2 - ref2)) < 1e-4, "padded-batch mismatch"

    print("KERNEL_OK")
</pallas_src>

<mosaic_0001>
module attributes {stable_mosaic.version = 11 : i64} {
  func.func @kernel(%arg0: i32, %arg1: memref<8x4xf32, #tpu.memory_space<vmem>>, %arg2: memref<8x4xf32, #tpu.memory_space<vmem>>, %arg3: memref<8x16xf32, #tpu.memory_space<vmem>>, %arg4: memref<8x16xf32, #tpu.memory_space<vmem>>, %arg5: memref<304x128xf32, #tpu.memory_space<vmem>>, %arg6: memref<8x128xf32, #tpu.memory_space<vmem>>, %arg7: memref<8x1xf32, #tpu.memory_space<vmem>>) attributes {dimension_semantics = [#tpu.dimension_semantics<parallel>], iteration_bounds = array<i64: 1>, scalar_prefetch = 0 : i64, scratch_operands = 0 : i64, tpu.core_type = #tpu.core_type<tc>, window_params = [{transform_indices = @transform_0, window_bounds = array<i64: 8, 4>}, {transform_indices = @transform_1, window_bounds = array<i64: 8, 4>}, {transform_indices = @transform_2, window_bounds = array<i64: 8, 16>}, {transform_indices = @transform_3, window_bounds = array<i64: 8, 16>}, {pipeline_mode = #tpu.pipeline_mode<synchronous>, transform_indices = @transform_4, window_bounds = array<i64: 304, 128>}, {pipeline_mode = #tpu.pipeline_mode<synchronous>, transform_indices = @transform_5, window_bounds = array<i64: 8, 128>}, {transform_indices = @transform_6, window_bounds = array<i64: 8, 1>}]} {
    %c0 = arith.constant 0 : index
    %c0_0 = arith.constant 0 : index
    %0 = vector.load %arg1[%c0, %c0_0] : memref<8x4xf32, #tpu.memory_space<vmem>>, vector<8x4xf32>
    %c0_1 = arith.constant 0 : index
    %c0_2 = arith.constant 0 : index
    %1 = vector.load %arg5[%c0_1, %c0_2] : memref<304x128xf32, #tpu.memory_space<vmem>>, vector<4x128xf32>
    %cst = arith.constant dense<0.000000e+00> : vector<8x128xf32>
    %2 = tpu.matmul %0, %1, %cst {dimension_numbers = #tpu.dot_dimension_numbers<[1], [0], [0], [1], [0, 0, 1, 1], [], []>} : vector<8x4xf32>, vector<4x128xf32>, vector<8x128xf32> -> vector<8x128xf32>
    %c0_3 = arith.constant 0 : index
    %c0_4 = arith.constant 0 : index
    %3 = vector.load %arg2[%c0_3, %c0_4] : memref<8x4xf32, #tpu.memory_space<vmem>>, vector<8x4xf32>
    %c8 = arith.constant 8 : index
    %c0_5 = arith.constant 0 : index
    %4 = vector.load %arg5[%c8, %c0_5] : memref<304x128xf32, #tpu.memory_space<vmem>>, vector<4x128xf32>
    %cst_6 = arith.constant dense<0.000000e+00> : vector<8x128xf32>
    %5 = tpu.matmul %3, %4, %cst_6 {dimension_numbers = #tpu.dot_dimension_numbers<[1], [0], [0], [1], [0, 0, 1, 1], [], []>} : vector<8x4xf32>, vector<4x128xf32>, vector<8x128xf32> -> vector<8x128xf32>
    %6 = arith.addf %2, %5 : vector<8x128xf32>
    %c0_7 = arith.constant 0 : index
    %c0_8 = arith.constant 0 : index
    %7 = vector.load %arg3[%c0_7, %c0_8] : memref<8x16xf32, #tpu.memory_space<vmem>>, vector<8x16xf32>
    %c16 = arith.constant 16 : index
    %c0_9 = arith.constant 0 : index
    %8 = vector.load %arg5[%c16, %c0_9] : memref<304x128xf32, #tpu.memory_space<vmem>>, vector<16x128xf32>
    %cst_10 = arith.constant dense<0.000000e+00> : vector<8x128xf32>
    %9 = tpu.matmul %7, %8, %cst_10 {dimension_numbers = #tpu.dot_dimension_numbers<[1], [0], [0], [1], [0, 0, 1, 1], [], []>} : vector<8x16xf32>, vector<16x128xf32>, vector<8x128xf32> -> vector<8x128xf32>
    %10 = arith.addf %6, %9 : vector<8x128xf32>
    %c0_11 = arith.constant 0 : index
    %c0_12 = arith.constant 0 : index
    %11 = vector.load %arg4[%c0_11, %c0_12] : memref<8x16xf32, #tpu.memory_space<vmem>>, vector<8x16xf32>
    %c32 = arith.constant 32 : index
    %c0_13 = arith.constant 0 : index
    %12 = vector.load %arg5[%c32, %c0_13] : memref<304x128xf32, #tpu.memory_space<vmem>>, vector<16x128xf32>
    %cst_14 = arith.constant dense<0.000000e+00> : vector<8x128xf32>
    %13 = tpu.matmul %11, %12, %cst_14 {dimension_numbers = #tpu.dot_dimension_numbers<[1], [0], [0], [1], [0, 0, 1, 1], [], []>} : vector<8x16xf32>, vector<16x128xf32>, vector<8x128xf32> -> vector<8x128xf32>
    %14 = arith.addf %10, %13 : vector<8x128xf32>
    %c0_15 = arith.constant 0 : index
    %c0_16 = arith.constant 0 : index
    %15 = vector.load %arg6[%c0_15, %c0_16] : memref<8x128xf32, #tpu.memory_space<vmem>>, vector<1x128xf32>
    %16 = vector.broadcast %15 : vector<1x128xf32> to vector<8x128xf32>
    %17 = arith.addf %14, %16 : vector<8x128xf32>
    %cst_17 = arith.constant 0.000000e+00 : f32
    %18 = vector.broadcast %cst_17 : f32 to vector<8x128xf32>
    %19 = arith.maximumf %17, %18 : vector<8x128xf32>
    %c48 = arith.constant 48 : index
    %c0_18 = arith.constant 0 : index
    %20 = vector.load %arg5[%c48, %c0_18] : memref<304x128xf32, #tpu.memory_space<vmem>>, vector<128x128xf32>
    %cst_19 = arith.constant dense<0.000000e+00> : vector<8x128xf32>
    %21 = tpu.matmul %19, %20, %cst_19 {dimension_numbers = #tpu.dot_dimension_numbers<[1], [0], [0], [1], [0, 0, 1, 1], [], []>} : vector<8x128xf32>, vector<128x128xf32>, vector<8x128xf32> -> vector<8x128xf32>
    %c1 = arith.constant 1 : index
    %c0_20 = arith.constant 0 : index
    %22 = vector.load %arg6[%c1, %c0_20] : memref<8x128xf32, #tpu.memory_space<vmem>>, vector<1x128xf32>
    %23 = vector.broadcast %22 : vector<1x128xf32> to vector<8x128xf32>
    %24 = arith.addf %21, %23 : vector<8x128xf32>
    %cst_21 = arith.constant 0.000000e+00 : f32
    %25 = vector.broadcast %cst_21 : f32 to vector<8x128xf32>
    %26 = arith.maximumf %24, %25 : vector<8x128xf32>
    %c176 = arith.constant 176 : index
    %c0_22 = arith.constant 0 : index
    %27 = vector.load %arg5[%c176, %c0_22] : memref<304x128xf32, #tpu.memory_space<vmem>>, vector<128x128xf32>
    %cst_23 = arith.constant dense<0.000000e+00> : vector<8x128xf32>
    %28 = tpu.matmul %26, %27, %cst_23 {dimension_numbers = #tpu.dot_dimension_numbers<[1], [0], [0], [1], [0, 0, 1, 1], [], []>} : vector<8x128xf32>, vector<128x128xf32>, vector<8x128xf32> -> vector<8x128xf32>
    %c2 = arith.constant 2 : index
    %c0_24 = arith.constant 0 : index
    %29 = vector.load %arg6[%c2, %c0_24] : memref<8x128xf32, #tpu.memory_space<vmem>>, vector<1x128xf32>
    %30 = vector.broadcast %29 : vector<1x128xf32> to vector<8x128xf32>
    %31 = arith.addf %28, %30 : vector<8x128xf32>
    %32 = vector.extract_strided_slice %31 {offsets = [0, 0], sizes = [8, 1], strides = [1, 1]} : vector<8x128xf32> to vector<8x1xf32>
    %c0_25 = arith.constant 0 : index
    %c0_26 = arith.constant 0 : index
    %33 = vector.load %arg7[%c0_25, %c0_26] : memref<8x1xf32, #tpu.memory_space<vmem>>, vector<8x1xf32>
    tpu.vector_store %arg7[%c0_25, %c0_26], %32 {strides = array<i32>} : memref<8x1xf32, #tpu.memory_space<vmem>>, vector<8x1xf32>,
    return
  }
  func.func @transform_0(%arg0: i32) -> (i32, i32) {
    %c0_i32 = arith.constant 0 : i32
    %c0_i32_0 = arith.constant 0 : i32
    return %arg0, %c0_i32 : i32, i32
  }
  func.func @transform_1(%arg0: i32) -> (i32, i32) {
    %c0_i32 = arith.constant 0 : i32
    %c0_i32_0 = arith.constant 0 : i32
    return %arg0, %c0_i32 : i32, i32
  }
  func.func @transform_2(%arg0: i32) -> (i32, i32) {
    %c0_i32 = arith.constant 0 : i32
    %c0_i32_0 = arith.constant 0 : i32
    return %arg0, %c0_i32 : i32, i32
  }
  func.func @transform_3(%arg0: i32) -> (i32, i32) {
    %c0_i32 = arith.constant 0 : i32
    %c0_i32_0 = arith.constant 0 : i32
    return %arg0, %c0_i32 : i32, i32
  }
  func.func @transform_4(%arg0: i32) -> (i32, i32) {
    %c0_i32 = arith.constant 0 : i32
    %c0_i32_0 = arith.constant 0 : i32
    %c0_i32_1 = arith.constant 0 : i32
    return %c0_i32, %c0_i32_0 : i32, i32
  }
  func.func @transform_5(%arg0: i32) -> (i32, i32) {
    %c0_i32 = arith.constant 0 : i32
    %c0_i32_0 = arith.constant 0 : i32
    %c0_i32_1 = arith.constant 0 : i32
    return %c0_i32, %c0_i32_0 : i32, i32
  }
  func.func @transform_6(%arg0: i32) -> (i32, i32) {
    %c0_i32 = arith.constant 0 : i32
    %c0_i32_0 = arith.constant 0 : i32
    return %arg0, %c0_i32 : i32, i32
  }
}

</mosaic_0001>

<bundles_post_ra>
// kernel: tpu_custom_call.1
= control target key start
LH: loop header
LB: loop body
LE: loop exit
PB: predicated region body
PF: predicated region fallthrough
CT: control target
= control target key end

     0   :  { %11 = vsyncpa [#allocation3], 0  ;;  %s278_s24 = smov [#allocation2]   ;;  %s279_s26 = smov 128   ;;  %s343_s0 = inlined_call_operand.vmem [shape: f32[8,4], index: 0, kind: input, shape index: {}]   ;;  %s344_s1 = inlined_call_operand.vmem [shape: f32[8,4], index: 1, kind: input, shape index: {}]   ;;  %s345_s2 = inlined_call_operand.vmem [shape: f32[8,16], index: 2, kind: input, shape index: {}]   ;;  %s346_s3 = inlined_call_operand.vmem [shape: f32[8,16], index: 3, kind: input, shape index: {}]   ;;  %s347_s4 = inlined_call_operand.hbm [shape: f32[304,128], index: 4, kind: input, shape index: {}]   ;;  %s348_s5 = inlined_call_operand.vmem [shape: f32[8,128], index: 5, kind: input, shape index: {}]   ;;  %s349_s6 = inlined_call_operand.vmem [shape: f32[8,1], index: 6, kind: output, shape index: {}]  }
   0x1   :  { %s24_s23 = sshll.u32 %s347_s4, 4  ;;  %s26_s25 = sshll.u32 %s278_s24, 4  ;;  %s25_s23 = int_to_ptr.hbm [resolvable:$true] %s24_s23  ;;  %s27_s25 = int_to_ptr.vmem [resolvable:$true] %s26_s25 }
   0x2   :  { %s280_s27 = smov 8  }
   0x3   :  { %32 = dma.hbm_to_vmem [thread:$0]  %s25_s23, 4864, %s27_s25, [#allocation3], %s279_s26, %s279_s26, %s280_s27  }
   0x4   :  { %276 = dma.done.wait [#allocation3], 4864  }
   0x5   :  { %277 = vsyncadd [#allocation3], 4294962432  ;;  %vm47_vm0 = vcmask 1043456   ;;  %vm43_vm1 = vcmask 31744   ;;  %v42_v0 = vld [vmem:[#allocation2 + $0x8] sm:$0xf] }
   0x6   :  { %v40_v1 = vld [vmem:[#allocation2] sm:$0xf]  ;;  %240 = vmatpush.msk.msra.mxu2 %vm47_vm0, %v42_v0  ;;  %v99_v4 = vld [vmem:[#allocation2 + $0x18] sm:$0xff]  ;;  %v127_v5 = vld [vmem:[#allocation2 + $0x28] sm:$0xff]  ;;  %vm100_vm2 = vcmask 130048   ;;  %vm233_vm3 = vcmask 7168  }
   0x7   :  { %v41_v2 = vld [vmem:[%s344_s1] sm:$0xff]  ;;  %242 = vmatpush.msk.msra.mxu3 %vm47_vm0, %v40_v1  ;;  %v98_v6 = vld [vmem:[#allocation2 + $0x10] sm:$0xff]  ;;  %v171_v8 = vld [vmem:[#allocation2 + $0xa8] sm:$0xff] }
   0x8   :  { %v39_v3 = vld [vmem:[%s343_s0] sm:$0xff]  ;;  %241 = vmatmul.msk.f32.vlgmr.msra.gmra.mxu2 %vm43_vm1, %v41_v2  ;;  %174 = vmatpush.msra.mxu0 %v171_v8  ;;  %v169_v10 = vld [vmem:[#allocation2 + $0x98] sm:$0xff]  ;;  %v168_v13 = vld [vmem:[#allocation2 + $0x90] sm:$0xff] }
   0x9   :  { %243 = vmatmul.msk.f32.vlgmr.msra.gmra.mxu3 %vm43_vm1, %v39_v3  ;;  %v126_v7 = vld [vmem:[#allocation2 + $0x20] sm:$0xff]  ;;  %118 = vmatpush.msrb.mxu2 %v99_v4  ;;  %v167_v14 = vld [vmem:[#allocation2 + $0x88] sm:$0xff]  ;;  %v165_v16 = vld [vmem:[#allocation2 + $0x78] sm:$0xff] }
   0xa   :  { %145 = vmatpush.msrb.mxu3 %v127_v5  ;;  %v170_v9 = vld [vmem:[#allocation2 + $0xa0] sm:$0xff]  ;;  %v164_v17 = vld [vmem:[#allocation2 + $0x70] sm:$0xff]  ;;  %v163_v18 = vld [vmem:[#allocation2 + $0x68] sm:$0xff] }
   0xb   :  { %119 = vmatpush.msrb.mxu2 %v98_v6  ;;  %175 = vmatpush.msra.mxu0 %v170_v9  ;;  %v97_v11 = vld [vmem:[%s345_s2] sm:$0xff]  ;;  %v161_v20 = vld [vmem:[#allocation2 + $0x58] sm:$0xff]  ;;  %v160_v21 = vld [vmem:[#allocation2 + $0x50] sm:$0xff] }
   0xc   :  { %146 = vmatpush.msrb.mxu3 %v126_v7  ;;  %v125_v12 = vld [vmem:[%s346_s3] sm:$0xff]  ;;  %v159_v22 = vld [vmem:[#allocation2 + $0x48] sm:$0xff]  ;;  %v157_v24 = vld [vmem:[#allocation2 + $0x38] sm:$0xff] }
   0xd   :  { %176 = vmatpush.msra.mxu0 %v169_v10  ;;  %v166_v15 = vld [vmem:[#allocation2 + $0x80] sm:$0xff]  ;;  %v156_v25 = vld [vmem:[#allocation2 + $0x30] sm:$0xff]  ;;  %v210_v26 = vld [vmem:[#allocation2 + $0x128] sm:$0xff] }
   0xe   :  { %v162_v19 = vld [vmem:[#allocation2 + $0x60] sm:$0xff]  ;;  %213 = vmatpush.msra.mxu1 %v210_v26  ;;  %v208_v28 = vld [vmem:[#allocation2 + $0x118] sm:$0xff]  ;;  %v207_v29 = vld [vmem:[#allocation2 + $0x110] sm:$0xff] }
   0xf   :  { %177 = vmatpush.msra.mxu0 %v168_v13  ;;  %v158_v23 = vld [vmem:[#allocation2 + $0x40] sm:$0xff]  ;;  %v206_v30 = vld [vmem:[#allocation2 + $0x108] sm:$0xff]  ;;  %v204_v32 = vld [vmem:[#allocation2 + $0xf8] sm:$0xff] }
  0x10   :  { %244 = vmatmul.msk.f32.vlgmr.msrb.gmra.mxu2 %vm100_vm2, %v97_v11  ;;  %v209_v27 = vld [vmem:[#allocation2 + $0x120] sm:$0xff]  ;;  %v203_v33 = vld [vmem:[#allocation2 + $0xf0] sm:$0xff]  ;;  %v202_v34 = vld [vmem:[#allocation2 + $0xe8] sm:$0xff] }
  0x11   :  { %245 = vmatmul.msk.f32.vlgmr.msrb.gmra.mxu3 %vm100_vm2, %v125_v12  ;;  %178 = vmatpush.msra.mxu0 %v167_v14  ;;  %v205_v31 = vld [vmem:[#allocation2 + $0x100] sm:$0xff]  ;;  %v200_v38 = vld [vmem:[#allocation2 + $0xd8] sm:$0xff]  ;;  %v199_v39 = vld [vmem:[#allocation2 + $0xd0] sm:$0xff] }
  0x12   :  { %214 = vmatpush.msra.mxu1 %v209_v27  ;;  %v201_v37 = vld [vmem:[#allocation2 + $0xe0] sm:$0xff]  ;;  %v198_v41 = vld [vmem:[#allocation2 + $0xc8] sm:$0xff]  ;;  %v196_v50 = vld [vmem:[#allocation2 + $0xb8] sm:$0xff] }
  0x13   :  { %179 = vmatpush.msra.mxu0 %v166_v15  ;;  %v249_v45 = vld [vmem:[%s348_s5] ss:$0 sm:$0xff]  ;;  %v195_v51 = vld [vmem:[#allocation2 + $0xb0] sm:$0xff]  ;;  %v250_v52 = vld [vmem:[%s348_s5 + $0x1] ss:$0 sm:$0xff] }
  0x14   :  { %215 = vmatpush.msra.mxu1 %v208_v28  ;;  %v197_v49 = vld [vmem:[#allocation2 + $0xc0] sm:$0xff] }
  0x15   :  { %180 = vmatpush.msra.mxu0 %v165_v16  ;;  %v251_v56 = vld [vmem:[%s348_s5 + $0x2] ss:$0 sm:$0xff] }
  0x16   :  { %216 = vmatpush.msra.mxu1 %v207_v29 }
  0x17   :  { %181 = vmatpush.msra.mxu0 %v164_v17 }
  0x18   :  { %217 = vmatpush.msra.mxu1 %v206_v30 }
  0x19   :  { %182 = vmatpush.msra.mxu0 %v163_v18 }
  0x1a   :  { %218 = vmatpush.msra.mxu1 %v205_v31 }
  0x1b   :  { %183 = vmatpush.msra.mxu0 %v162_v19 }
  0x1c   :  { %219 = vmatpush.msra.mxu1 %v204_v32 }
  0x1d   :  { %184 = vmatpush.msra.mxu0 %v161_v20 }
  0x1e   :  { %220 = vmatpush.msra.mxu1 %v203_v33 }
  0x1f   :  { %185 = vmatpush.msra.mxu0 %v160_v21 }
  0x20   :  { %221 = vmatpush.msra.mxu1 %v202_v34 }
  0x21   :  { %186 = vmatpush.msra.mxu0 %v159_v22 }
  0x22   :  { %222 = vmatpush.msra.mxu1 %v201_v37 }
  0x23   :  { %187 = vmatpush.msra.mxu0 %v158_v23 }
  0x24   :  { %223 = vmatpush.msra.mxu1 %v200_v38 }
  0x25   :  { %188 = vmatpush.msra.mxu0 %v157_v24 }
  0x26   :  { %224 = vmatpush.msra.mxu1 %v199_v39 }
  0x27   :  { %189 = vmatpush.msra.mxu0 %v156_v25 }
  0x28   :  { %225 = vmatpush.msra.mxu1 %v198_v41 }
  0x2a   :  { %226 = vmatpush.msra.mxu1 %v197_v49 }
  0x2c   :  { %227 = vmatpush.msra.mxu1 %v196_v50 }
  0x2e   :  { %228 = vmatpush.msra.mxu1 %v195_v51 }
  0x8b   :  { %v68_v35 = vpop.f32.mrf.mxu2 }
  0x8c   :  { %v94_v36 = vpop.f32.mrf.mxu3 }
  0x8d   :  { %v95_v40 = vadd.f32 %v94_v36, %v68_v35 }
  0x93   :  { %v121_v42 = vpop.f32.mrf.mxu2 }
  0x94   :  { %v148_v43 = vpop.f32.mrf.mxu3  ;;  %v124_v44 = vadd.f32 %v121_v42, %v95_v40 }
  0x96   :  { %v151_v46 = vadd.f32 %v148_v43, %v124_v44 }
  0x98   :  { %v154_v47 = vadd.f32 %v249_v45, %v151_v46 }
  0x9a   :  { %v155_v48 = vmax.f32 %v154_v47, 0.0 }
  0x9c   :  { %190 = vmatmul.f32.vlgmr.msra.gmra.mxu0 %v155_v48 }
 0x119   :  { %v191_v53 = vpop.f32.mrf.mxu0 }
 0x11a   :  { %v192_v54 = vadd.f32 %v250_v52, %v191_v53 }
 0x11c   :  { %v194_v55 = vmax.f32 %v192_v54, 0.0 }
 0x11e   :  { %229 = vmatmul.f32.vlgmr.msra.gmra.mxu1 %v194_v55 }
 0x19b   :  { %v230_v57 = vpop.f32.mrf.mxu1 }
 0x19c   :  { %v231_v58 = vadd.f32 %v251_v56, %v230_v57 }
 0x19e   :  { %234 = vst.msk [vmem:[%s349_s6] sm:$0xff] %vm233_vm3, %v231_v58 }
 0x19f   :  { %239 = vsyncpa [#allocation3], 1 }

</bundles_post_ra>
